<compile_context>
chip_gen: v5e
topology: v5e:2x2
jax: 0.10.0
libtpu: 0.0.40
codegen_flags: <defaults>
</compile_context>

<pallas_src>
import functools

import jax
import jax.numpy as jnp
from jax.experimental import pallas as pl
from jax.experimental.pallas import tpu as pltpu

INPUT_SIZE = 10
HIDDEN_SIZE = 20
OUTPUT_SIZE = 5

LANES = 128          # TPU lane width: every feature dim is padded to this
SUBLANES = 8         # f32 sublane count: batch padded to a multiple of this
MAX_T_BLOCK = 16     # timesteps unrolled per grid step


def rnn_seq_kernel(px_ref, h0_ref, wh_ref, wy_ref, by_ref,
                   y_ref, h_out_ref, h_scr, hseq_scr,
                   *, t_block, last_t_local):
    """Grid = (batch_blocks, T_chunks).

    px_ref   : (t_block, B_BLOCK, 128) precomputed x @ Wx + (bx + bh)
    h0_ref   : (B_BLOCK, 128) initial hidden state
    wh_ref   : (128, 128) packed Wh (nonzero only in [:H, :H])
    wy_ref   : (128, 128) packed Wy (nonzero only in [:H, :OUT])
    by_ref   : (1, 128)   packed by
    y_ref    : (t_block, B_BLOCK, 128) outputs for this chunk
    h_out_ref: (B_BLOCK, 128) final hidden state (aliased with h0's buffer)
    h_scr    : (B_BLOCK, 128) VMEM-resident hidden-state carry
    hseq_scr : (t_block, B_BLOCK, 128) per-chunk hidden-state stash
    """
    tb = pl.program_id(1)

    @pl.when(tb == 0)
    def _init():
        h_scr[...] = h0_ref[...]

    wh = wh_ref[...]
    h = h_scr[...]
    # Serial recurrence, statically unrolled: the only work on the critical
    # path is one (B_BLOCK,128)x(128,128) MXU matmul + VPU add + EUP tanh.
    # Wh/pre_x are exactly zero outside the first HIDDEN_SIZE lanes, so h stays
    # exactly zero there (tanh(0) == 0) and no masking is needed.
    for t in range(t_block):
        h = jnp.tanh(px_ref[t] +
                     jnp.dot(h, wh, preferred_element_type=jnp.float32))
        hseq_scr[t] = h
    h_scr[...] = h

    # Deferred output projection: ONE MXU matmul per chunk, M = t_block*B_BLOCK.
    b_block = h_scr.shape[0]
    hs = hseq_scr[...].reshape(t_block * b_block, LANES)
    ys = jnp.dot(hs, wy_ref[...], preferred_element_type=jnp.float32) + by_ref[...]
    y_ref[...] = ys.reshape(y_ref.shape).astype(y_ref.dtype)

    @pl.when(tb == pl.num_programs(1) - 1)
    def _fin():
        # When T % t_block != 0 the last valid step is not the last unrolled
        # one; read it straight from the stash (the padded trailing steps only
        # pollute h_scr / later stash rows, which are never read again).
        h_out_ref[...] = hseq_scr[last_t_local]


def _round_up(x, m):
    return ((x + m - 1) // m) * m


@jax.jit
def rnn_forward_seq(xs, h0, params):
    """Run T RNN steps in one pallas_call.

    xs: (T, B, INPUT_SIZE), h0: (B, HIDDEN_SIZE)
    returns ys: (T, B, OUTPUT_SIZE), h_T: (B, HIDDEN_SIZE)
    """
    T, B, _ = xs.shape
    wx_t, bx, wh_t, bh, wy_t, by = params

    # Fill MXU rows when the real batch allows it; >=2 batch blocks also lets
    # v7x's second TensorCore take half the "parallel" axis.
    b_block = 128 if B >= 128 else SUBLANES
    b_pad = _round_up(B, b_block)
    nb = b_pad // b_block
    t_block = min(MAX_T_BLOCK, T)
    n_tc = -(-T // t_block)
    t_pad = n_tc * t_block

    # Hoisted, non-recurrent input projection: one GEMM at M = T*B.
    pre = xs.reshape(T * B, INPUT_SIZE) @ wx_t + (bx + bh)          # (T*B, H)
    px_pad = jnp.zeros((t_pad, b_pad, LANES), jnp.float32)
    px_pad = px_pad.at[:T, :B, :HIDDEN_SIZE].set(pre.reshape(T, B, HIDDEN_SIZE))

    h0_pad = jnp.zeros((b_pad, LANES), jnp.float32).at[:B, :HIDDEN_SIZE].set(h0)

    wh_p = jnp.zeros((LANES, LANES), jnp.float32).at[:HIDDEN_SIZE, :HIDDEN_SIZE].set(wh_t)
    wy_p = jnp.zeros((LANES, LANES), jnp.float32).at[:HIDDEN_SIZE, :OUTPUT_SIZE].set(wy_t)
    by_p = jnp.zeros((1, LANES), jnp.float32).at[:, :OUTPUT_SIZE].set(by)

    kernel = functools.partial(rnn_seq_kernel, t_block=t_block,
                               last_t_local=(T - 1) % t_block)

    ys_pad, h_pad = pl.pallas_call(
        kernel,
        out_shape=(
            jax.ShapeDtypeStruct((t_pad, b_pad, LANES), jnp.float32),
            jax.ShapeDtypeStruct((b_pad, LANES), jnp.float32),
        ),
        grid_spec=pltpu.PrefetchScalarGridSpec(
            num_scalar_prefetch=0,
            grid=(nb, n_tc),
            in_specs=[
                pl.BlockSpec((t_block, b_block, LANES), lambda b, t: (t, b, 0)),  # pre_x
                pl.BlockSpec((b_block, LANES), lambda b, t: (b, 0)),              # h0
                pl.BlockSpec((LANES, LANES), lambda b, t: (0, 0)),                # Wh (resident)
                pl.BlockSpec((LANES, LANES), lambda b, t: (0, 0)),                # Wy (resident)
                pl.BlockSpec((1, LANES), lambda b, t: (0, 0)),                    # by
            ],
            out_specs=(
                pl.BlockSpec((t_block, b_block, LANES), lambda b, t: (t, b, 0)),  # y chunk
                pl.BlockSpec((b_block, LANES), lambda b, t: (b, 0)),              # final h
            ),
            scratch_shapes=[
                pltpu.VMEM((b_block, LANES), jnp.float32),            # h carry
                pltpu.VMEM((t_block, b_block, LANES), jnp.float32),   # chunk h stash
            ],
        ),
        compiler_params=pltpu.CompilerParams(
            dimension_semantics=("parallel", "arbitrary")),
        # h0_pad is a fresh padded copy created inside this jit, so aliasing its
        # HBM buffer with the final-h output never clobbers caller-owned data.
        input_output_aliases={1: 1},
    )(px_pad, h0_pad, wh_p, wy_p, by_p)

    return ys_pad[:T, :B, :OUTPUT_SIZE], h_pad[:B, :HIDDEN_SIZE]


def rnn_forward(x, h, params):
    """One RNN step, matching the PyTorch module's forward(x, h) -> (y_hat, h)."""
    ys, h_new = rnn_forward_seq(x[None, ...], h, params)
    return ys[0], h_new


def init_params(key):
    """Deterministic init mimicking nn.Linear's U(-1/sqrt(fan_in), 1/sqrt(fan_in))."""
    ks = jax.random.split(key, 6)

    def linear(kw, kb, fan_in, fan_out):
        bound = 1.0 / jnp.sqrt(fan_in)
        # store transposed: (fan_in, fan_out) so we compute x @ W + b
        w_t = jax.random.uniform(kw, (fan_in, fan_out), jnp.float32, -bound, bound)
        b = jax.random.uniform(kb, (1, fan_out), jnp.float32, -bound, bound)
        return w_t, b

    wx_t, bx = linear(ks[0], ks[1], INPUT_SIZE, HIDDEN_SIZE)   # x2h
    wh_t, bh = linear(ks[2], ks[3], HIDDEN_SIZE, HIDDEN_SIZE)  # h2h
    wy_t, by = linear(ks[4], ks[5], HIDDEN_SIZE, OUTPUT_SIZE)  # h2y
    return wx_t, bx, wh_t, bh, wy_t, by


def init_hidden(batch=1):
    return jnp.zeros((batch, HIDDEN_SIZE), jnp.float32)


def rnn_seq_reference(xs, h0, params):
    wx_t, bx, wh_t, bh, wy_t, by = params

    def step(h, x):
        h = jnp.tanh(x @ wx_t + bx + h @ wh_t + bh)
        y = h @ wy_t + by
        return h, y

    h_final, ys = jax.lax.scan(step, h0, xs)
    return ys, h_final


if __name__ == "__main__":
    key = jax.random.PRNGKey(0)
    k_params, k_x, k_seq, k_seq2 = jax.random.split(key, 4)

    params = init_params(k_params)

    # --- Single-step forward, matching the PyTorch module exactly ---
    x = jax.random.normal(k_x, (1, INPUT_SIZE), jnp.float32)
    h = init_hidden(batch=1)
    y_hat, h_new = rnn_forward(x, h, params)
    jax.block_until_ready((y_hat, h_new))

    wx_t, bx, wh_t, bh, wy_t, by = params
    h_ref = jnp.tanh(x @ wx_t + bx + h @ wh_t + bh)
    y_ref = h_ref @ wy_t + by
    assert y_hat.shape == (1, OUTPUT_SIZE) and h_new.shape == (1, HIDDEN_SIZE)
    assert jnp.allclose(y_hat, y_ref, atol=1e-5), "single-step y mismatch"
    assert jnp.allclose(h_new, h_ref, atol=1e-5), "single-step h mismatch"

    # --- Sequence-fused path: T steps, one pallas_call total ---
    T, B = 8, 2
    xs = jax.random.normal(k_seq, (T, B, INPUT_SIZE), jnp.float32)
    h0 = init_hidden(batch=B)
    ys, h_T = rnn_forward_seq(xs, h0, params)
    jax.block_until_ready((ys, h_T))
    ys_ref, h_T_ref = rnn_seq_reference(xs, h0, params)
    assert jnp.allclose(ys, ys_ref, atol=1e-5), "sequence y mismatch"
    assert jnp.allclose(h_T, h_T_ref, atol=1e-5), "sequence h mismatch"

    # --- Remainder path: T not a multiple of the unroll factor ---
    T2, B2 = 19, 3
    xs2 = jax.random.normal(k_seq2, (T2, B2, INPUT_SIZE), jnp.float32)
    h02 = init_hidden(batch=B2)
    ys2, h_T2 = rnn_forward_seq(xs2, h02, params)
    jax.block_until_ready((ys2, h_T2))
    ys2_ref, h_T2_ref = rnn_seq_reference(xs2, h02, params)
    assert jnp.allclose(ys2, ys2_ref, atol=1e-5), "remainder y mismatch"
    assert jnp.allclose(h_T2, h_T2_ref, atol=1e-5), "remainder h mismatch"

    print("KERNEL_OK")
</pallas_src>

<mosaic_0001>
module attributes {stable_mosaic.version = 11 : i64} {
  func.func @rnn_seq_kernel(%arg0: i32, %arg1: i32, %arg2: memref<1x8x128xf32, #tpu.memory_space<vmem>>, %arg3: memref<8x128xf32, #tpu.memory_space<vmem>>, %arg4: memref<128x128xf32, #tpu.memory_space<vmem>>, %arg5: memref<128x128xf32, #tpu.memory_space<vmem>>, %arg6: memref<1x128xf32, #tpu.memory_space<vmem>>, %arg7: memref<1x8x128xf32, #tpu.memory_space<vmem>>, %arg8: memref<8x128xf32, #tpu.memory_space<vmem>>, %arg9: memref<8x128xf32, #tpu.memory_space<vmem>>, %arg10: memref<1x8x128xf32, #tpu.memory_space<vmem>>) attributes {dimension_semantics = [#tpu.dimension_semantics<parallel>, #tpu.dimension_semantics<arbitrary>], iteration_bounds = array<i64: 1, 1>, scalar_prefetch = 0 : i64, scratch_operands = 2 : i64, tpu.core_type = #tpu.core_type<tc>, window_params = [{transform_indices = @transform_0, window_bounds = array<i64: 1, 8, 128>}, {transform_indices = @transform_1, window_bounds = array<i64: 8, 128>}, {pipeline_mode = #tpu.pipeline_mode<synchronous>, transform_indices = @transform_2, window_bounds = array<i64: 128, 128>}, {pipeline_mode = #tpu.pipeline_mode<synchronous>, transform_indices = @transform_3, window_bounds = array<i64: 128, 128>}, {pipeline_mode = #tpu.pipeline_mode<synchronous>, transform_indices = @transform_4, window_bounds = array<i64: 1, 128>}, {transform_indices = @transform_5, window_bounds = array<i64: 1, 8, 128>}, {transform_indices = @transform_6, window_bounds = array<i64: 8, 128>}]} {
    %c0_i32 = arith.constant 0 : i32
    %0 = arith.cmpi eq, %arg1, %c0_i32 : i32
    %1 = arith.extui %0 : i1 to i32
    %c0_i32_0 = arith.constant 0 : i32
    %2 = arith.cmpi ne, %1, %c0_i32_0 : i32
    scf.if %2 {
      %c0_25 = arith.constant 0 : index
      %c0_26 = arith.constant 0 : index
      %26 = vector.load %arg3[%c0_25, %c0_26] : memref<8x128xf32, #tpu.memory_space<vmem>>, vector<8x128xf32>
      %c0_27 = arith.constant 0 : index
      %c0_28 = arith.constant 0 : index
      %27 = vector.load %arg9[%c0_27, %c0_28] : memref<8x128xf32, #tpu.memory_space<vmem>>, vector<8x128xf32>
      tpu.vector_store %arg9[%c0_27, %c0_28], %26 {strides = array<i32>} : memref<8x128xf32, #tpu.memory_space<vmem>>, vector<8x128xf32>,
    } else {
    }
    %c0 = arith.constant 0 : index
    %c0_1 = arith.constant 0 : index
    %3 = vector.load %arg4[%c0, %c0_1] : memref<128x128xf32, #tpu.memory_space<vmem>>, vector<128x128xf32>
    %c0_2 = arith.constant 0 : index
    %c0_3 = arith.constant 0 : index
    %4 = vector.load %arg9[%c0_2, %c0_3] : memref<8x128xf32, #tpu.memory_space<vmem>>, vector<8x128xf32>
    %c0_4 = arith.constant 0 : index
    %c0_5 = arith.constant 0 : index
    %c0_6 = arith.constant 0 : index
    %5 = vector.load %arg2[%c0_4, %c0_5, %c0_6] : memref<1x8x128xf32, #tpu.memory_space<vmem>>, vector<1x8x128xf32>
    %6 = vector.shape_cast %5 : vector<1x8x128xf32> to vector<8x128xf32>
    %cst = arith.constant dense<0.000000e+00> : vector<8x128xf32>
    %7 = tpu.matmul %4, %3, %cst {dimension_numbers = #tpu.dot_dimension_numbers<[1], [0], [0], [1], [0, 0, 1, 1], [], []>} : vector<8x128xf32>, vector<128x128xf32>, vector<8x128xf32> -> vector<8x128xf32>
    %8 = arith.addf %6, %7 : vector<8x128xf32>
    %9 = math.tanh %8 : vector<8x128xf32>
    %c0_7 = arith.constant 0 : index
    %c0_8 = arith.constant 0 : index
    %c0_9 = arith.constant 0 : index
    %10 = vector.load %arg10[%c0_7, %c0_8, %c0_9] : memref<1x8x128xf32, #tpu.memory_space<vmem>>, vector<1x8x128xf32>
    %11 = vector.shape_cast %10 : vector<1x8x128xf32> to vector<8x128xf32>
    %12 = vector.shape_cast %9 : vector<8x128xf32> to vector<1x8x128xf32>
    tpu.vector_store %arg10[%c0_7, %c0_8, %c0_9], %12 {strides = array<i32>} : memref<1x8x128xf32, #tpu.memory_space<vmem>>, vector<1x8x128xf32>,
    %c0_10 = arith.constant 0 : index
    %c0_11 = arith.constant 0 : index
    %13 = vector.load %arg9[%c0_10, %c0_11] : memref<8x128xf32, #tpu.memory_space<vmem>>, vector<8x128xf32>
    tpu.vector_store %arg9[%c0_10, %c0_11], %9 {strides = array<i32>} : memref<8x128xf32, #tpu.memory_space<vmem>>, vector<8x128xf32>,
    %c0_12 = arith.constant 0 : index
    %c0_13 = arith.constant 0 : index
    %c0_14 = arith.constant 0 : index
    %14 = vector.load %arg10[%c0_12, %c0_13, %c0_14] : memref<1x8x128xf32, #tpu.memory_space<vmem>>, vector<1x8x128xf32>
    %15 = vector.shape_cast %14 : vector<1x8x128xf32> to vector<8x128xf32>
    %c0_15 = arith.constant 0 : index
    %c0_16 = arith.constant 0 : index
    %16 = vector.load %arg5[%c0_15, %c0_16] : memref<128x128xf32, #tpu.memory_space<vmem>>, vector<128x128xf32>
    %cst_17 = arith.constant dense<0.000000e+00> : vector<8x128xf32>
    %17 = tpu.matmul %15, %16, %cst_17 {dimension_numbers = #tpu.dot_dimension_numbers<[1], [0], [0], [1], [0, 0, 1, 1], [], []>} : vector<8x128xf32>, vector<128x128xf32>, vector<8x128xf32> -> vector<8x128xf32>
    %c0_18 = arith.constant 0 : index
    %c0_19 = arith.constant 0 : index
    %18 = vector.load %arg6[%c0_18, %c0_19] : memref<1x128xf32, #tpu.memory_space<vmem>>, vector<1x128xf32>
    %19 = vector.broadcast %18 : vector<1x128xf32> to vector<8x128xf32>
    %20 = arith.addf %17, %19 : vector<8x128xf32>
    %21 = vector.shape_cast %20 : vector<8x128xf32> to vector<1x8x128xf32>
    %c0_20 = arith.constant 0 : index
    %c0_21 = arith.constant 0 : index
    %c0_22 = arith.constant 0 : index
    %22 = vector.load %arg7[%c0_20, %c0_21, %c0_22] : memref<1x8x128xf32, #tpu.memory_space<vmem>>, vector<1x8x128xf32>
    tpu.vector_store %arg7[%c0_20, %c0_21, %c0_22], %21 {strides = array<i32>} : memref<1x8x128xf32, #tpu.memory_space<vmem>>, vector<1x8x128xf32>,
    %c0_i32_23 = arith.constant 0 : i32
    %23 = arith.cmpi eq, %arg1, %c0_i32_23 : i32
    %24 = arith.extui %23 : i1 to i32
    %c0_i32_24 = arith.constant 0 : i32
    %25 = arith.cmpi ne, %24, %c0_i32_24 : i32
    scf.if %25 {
      %c0_25 = arith.constant 0 : index
      %c0_26 = arith.constant 0 : index
      %c0_27 = arith.constant 0 : index
      %26 = vector.load %arg10[%c0_25, %c0_26, %c0_27] : memref<1x8x128xf32, #tpu.memory_space<vmem>>, vector<1x8x128xf32>
      %27 = vector.shape_cast %26 : vector<1x8x128xf32> to vector<8x128xf32>
      %c0_28 = arith.constant 0 : index
      %c0_29 = arith.constant 0 : index
      %28 = vector.load %arg8[%c0_28, %c0_29] : memref<8x128xf32, #tpu.memory_space<vmem>>, vector<8x128xf32>
      tpu.vector_store %arg8[%c0_28, %c0_29], %27 {strides = array<i32>} : memref<8x128xf32, #tpu.memory_space<vmem>>, vector<8x128xf32>,
    } else {
    }
    return
  }
  func.func @transform_0(%arg0: i32, %arg1: i32) -> (i32, i32, i32) {
    %c0_i32 = arith.constant 0 : i32
    %c0_i32_0 = arith.constant 0 : i32
    return %arg1, %arg0, %c0_i32 : i32, i32, i32
  }
  func.func @transform_1(%arg0: i32, %arg1: i32) -> (i32, i32) {
    %c0_i32 = arith.constant 0 : i32
    %c0_i32_0 = arith.constant 0 : i32
    return %arg0, %c0_i32 : i32, i32
  }
  func.func @transform_2(%arg0: i32, %arg1: i32) -> (i32, i32) {
    %c0_i32 = arith.constant 0 : i32
    %c0_i32_0 = arith.constant 0 : i32
    %c0_i32_1 = arith.constant 0 : i32
    return %c0_i32, %c0_i32_0 : i32, i32
  }
  func.func @transform_3(%arg0: i32, %arg1: i32) -> (i32, i32) {
    %c0_i32 = arith.constant 0 : i32
    %c0_i32_0 = arith.constant 0 : i32
    %c0_i32_1 = arith.constant 0 : i32
    return %c0_i32, %c0_i32_0 : i32, i32
  }
  func.func @transform_4(%arg0: i32, %arg1: i32) -> (i32, i32) {
    %c0_i32 = arith.constant 0 : i32
    %c0_i32_0 = arith.constant 0 : i32
    %c0_i32_1 = arith.constant 0 : i32
    return %c0_i32, %c0_i32_0 : i32, i32
  }
  func.func @transform_5(%arg0: i32, %arg1: i32) -> (i32, i32, i32) {
    %c0_i32 = arith.constant 0 : i32
    %c0_i32_0 = arith.constant 0 : i32
    return %arg1, %arg0, %c0_i32 : i32, i32, i32
  }
  func.func @transform_6(%arg0: i32, %arg1: i32) -> (i32, i32) {
    %c0_i32 = arith.constant 0 : i32
    %c0_i32_0 = arith.constant 0 : i32
    return %arg0, %c0_i32 : i32, i32
  }
}

</mosaic_0001>

<bundles_post_ra>
// kernel: rnn_forward_seq.1
= control target key start
LH: loop header
LB: loop body
LE: loop exit
PB: predicated region body
PF: predicated region fallthrough
CT: control target
= control target key end

     0   :  { %s274_s2 = inlined_call_operand.vmem [shape: f32[128,128], index: 2, kind: input, shape index: {}]   ;;  %s275_s3 = inlined_call_operand.vmem [shape: f32[128,128], index: 3, kind: input, shape index: {}]   ;;  %s276_s1 = inlined_call_operand.vmem [shape: f32[8,128], index: 1, kind: input, shape index: {}, may-alias: {1,6}]   ;;  %s277_s4 = inlined_call_operand.vmem [shape: f32[1,128], index: 4, kind: input, shape index: {}]   ;;  %s278_s0 = inlined_call_operand.vmem [shape: f32[1,8,128], index: 0, kind: input, shape index: {}]   ;;  %s279_s6 = inlined_call_operand.vmem [shape: f32[8,128], index: 6, kind: output, shape index: {1}, may-alias: {1,6}]   ;;  %s280_s5 = inlined_call_operand.vmem [shape: f32[1,8,128], index: 5, kind: output, shape index: {0}]  }
   0x1   :  { %v43_v0 = vld [vmem:[%s274_s2 + $0x78] sm:$0xff]  ;;  %v42_v1 = vld [vmem:[%s274_s2 + $0x70] sm:$0xff]  ;;  %v41_v2 = vld [vmem:[%s274_s2 + $0x68] sm:$0xff] }
   0x2   :  { %46 = vmatpush.msra.mxu0 %v43_v0  ;;  %v40_v3 = vld [vmem:[%s274_s2 + $0x60] sm:$0xff]  ;;  %v86_v4 = vld [vmem:[%s275_s3 + $0x78] sm:$0xff]  ;;  %v85_v6 = vld [vmem:[%s275_s3 + $0x70] sm:$0xff] }
   0x3   :  { %v39_v5 = vld [vmem:[%s274_s2 + $0x58] sm:$0xff]  ;;  %91 = vmatpush.msra.mxu1 %v86_v4  ;;  %v84_v7 = vld [vmem:[%s275_s3 + $0x68] sm:$0xff]  ;;  %v38_v8 = vld [vmem:[%s274_s2 + $0x50] sm:$0xff] }
   0x4   :  { %47 = vmatpush.msra.mxu0 %v42_v1  ;;  %v83_v9 = vld [vmem:[%s275_s3 + $0x60] sm:$0xff]  ;;  %v37_v10 = vld [vmem:[%s274_s2 + $0x48] sm:$0xff]  ;;  %v82_v11 = vld [vmem:[%s275_s3 + $0x58] sm:$0xff] }
   0x5   :  { %92 = vmatpush.msra.mxu1 %v85_v6  ;;  %v36_v12 = vld [vmem:[%s274_s2 + $0x40] sm:$0xff]  ;;  %v81_v13 = vld [vmem:[%s275_s3 + $0x50] sm:$0xff]  ;;  %v35_v14 = vld [vmem:[%s274_s2 + $0x38] sm:$0xff] }
   0x6   :  { %48 = vmatpush.msra.mxu0 %v41_v2  ;;  %v80_v15 = vld [vmem:[%s275_s3 + $0x48] sm:$0xff]  ;;  %v34_v16 = vld [vmem:[%s274_s2 + $0x30] sm:$0xff]  ;;  %v79_v17 = vld [vmem:[%s275_s3 + $0x40] sm:$0xff] }
   0x7   :  { %93 = vmatpush.msra.mxu1 %v84_v7  ;;  %v33_v18 = vld [vmem:[%s274_s2 + $0x28] sm:$0xff]  ;;  %v78_v19 = vld [vmem:[%s275_s3 + $0x38] sm:$0xff]  ;;  %v32_v20 = vld [vmem:[%s274_s2 + $0x20] sm:$0xff] }
   0x8   :  { %49 = vmatpush.msra.mxu0 %v40_v3  ;;  %v77_v21 = vld [vmem:[%s275_s3 + $0x30] sm:$0xff]  ;;  %v31_v22 = vld [vmem:[%s274_s2 + $0x18] sm:$0xff]  ;;  %v76_v23 = vld [vmem:[%s275_s3 + $0x28] sm:$0xff] }
   0x9   :  { %94 = vmatpush.msra.mxu1 %v83_v9  ;;  %v30_v24 = vld [vmem:[%s274_s2 + $0x10] sm:$0xff]  ;;  %v29_v25 = vld [vmem:[%s274_s2 + $0x8] sm:$0xff]  ;;  %v28_v26 = vld [vmem:[%s274_s2] sm:$0xff] }
   0xa   :  { %50 = vmatpush.msra.mxu0 %v39_v5  ;;  %v26_v27 = vld [vmem:[%s276_s1] sm:$0xff]  ;;  %v74_v29 = vld [vmem:[%s275_s3 + $0x18] sm:$0xff]  ;;  %v73_v30 = vld [vmem:[%s275_s3 + $0x10] sm:$0xff] }
   0xb   :  { %95 = vmatpush.msra.mxu1 %v82_v11  ;;  %v75_v28 = vld [vmem:[%s275_s3 + $0x20] sm:$0xff]  ;;  %v72_v31 = vld [vmem:[%s275_s3 + $0x8] sm:$0xff] }
   0xc   :  { %51 = vmatpush.msra.mxu0 %v38_v8  ;;  %v71_v32 = vld [vmem:[%s275_s3] sm:$0xff] }
   0xd   :  { %96 = vmatpush.msra.mxu1 %v81_v13  ;;  %v45_v33 = vld [vmem:[%s278_s0] sm:$0xff] }
   0xe   :  { %52 = vmatpush.msra.mxu0 %v37_v10  ;;  %v125_v37 = vld [vmem:[%s277_s4] ss:$0 sm:$0xff] }
   0xf   :  { %97 = vmatpush.msra.mxu1 %v80_v15 }
  0x10   :  { %53 = vmatpush.msra.mxu0 %v36_v12 }
  0x11   :  { %98 = vmatpush.msra.mxu1 %v79_v17 }
  0x12   :  { %54 = vmatpush.msra.mxu0 %v35_v14 }
  0x13   :  { %99 = vmatpush.msra.mxu1 %v78_v19 }
  0x14   :  { %55 = vmatpush.msra.mxu0 %v34_v16 }
  0x15   :  { %100 = vmatpush.msra.mxu1 %v77_v21 }
  0x16   :  { %56 = vmatpush.msra.mxu0 %v33_v18 }
  0x17   :  { %101 = vmatpush.msra.mxu1 %v76_v23 }
  0x18   :  { %57 = vmatpush.msra.mxu0 %v32_v20 }
  0x19   :  { %102 = vmatpush.msra.mxu1 %v75_v28 }
  0x1a   :  { %58 = vmatpush.msra.mxu0 %v31_v22 }
  0x1b   :  { %103 = vmatpush.msra.mxu1 %v74_v29 }
  0x1c   :  { %59 = vmatpush.msra.mxu0 %v30_v24 }
  0x1d   :  { %104 = vmatpush.msra.mxu1 %v73_v30 }
  0x1e   :  { %60 = vmatpush.msra.mxu0 %v29_v25 }
  0x1f   :  { %105 = vmatpush.msra.mxu1 %v72_v31 }
  0x20   :  { %61 = vmatpush.msra.mxu0 %v28_v26 }
  0x21   :  { %62 = vmatmul.f32.vlgmr.msra.gmra.mxu0 %v26_v27  ;;  %106 = vmatpush.msra.mxu1 %v71_v32 }
  0x9e   :  { %v63_v34 = vpop.f32.mrf.mxu0 }
  0x9f   :  { %v66_v35 = vadd.f32 %v63_v34, %v45_v33 }
  0xa1   :  { %126 = vtanh.f32 %v66_v35 }
  0xa7   :  { %v127_v36 = vpop.eup %126 }
  0xa8   :  { %116 = vst [vmem:[%s279_s6] sm:$0xff] %v127_v36  ;;  %107 = vmatmul.f32.vlgmr.msra.gmra.mxu1 %v127_v36 }
 0x125   :  { %v108_v38 = vpop.f32.mrf.mxu1 }
 0x126   :  { %v109_v39 = vadd.f32 %v125_v37, %v108_v38 }
 0x128   :  { %111 = vst [vmem:[%s280_s5] sm:$0xff] %v109_v39 }

</bundles_post_ra>
